<compile_context>
chip_gen: v7x
topology: tpu7x:2x2x1
jax: 0.10.0
libtpu: 0.0.40
codegen_flags: <defaults>
</compile_context>

<pallas_src>
import math
import functools

import jax
import jax.numpy as jnp
from jax.experimental import pallas as pl
from jax.experimental.pallas import tpu as pltpu


def _round_up(a, b):
    return (a + b - 1) // b * b


def _ada_ln_kernel(ts_ref, emb_ref, w_ref, b_ref, x_ref, o_ref, *, dim, eps):
    """One grid step normalizes a (tm, D) slab of tokens."""
    # --- timestep embedding -> SiLU -> fused (scale|shift) linear ---------
    ts = ts_ref[0]                                   # scalar from SMEM
    e = emb_ref[pl.ds(ts, 1), :].astype(jnp.float32)          # (1, D)
    se = e * jax.nn.sigmoid(e)                                  # SiLU
    emb2 = jnp.dot(se, w_ref[...],
                   preferred_element_type=jnp.float32) + b_ref[...]   # (1, 2D)
    scale = emb2[:, :dim]                                       # (1, D)
    shift = emb2[:, dim:]                                       # (1, D)

    # --- LayerNorm (no elementwise affine) over the channel axis ----------
    x = x_ref[...].astype(jnp.float32)                          # (tm, D)
    mean = jnp.mean(x, axis=-1, keepdims=True)
    xc = x - mean
    var = jnp.mean(xc * xc, axis=-1, keepdims=True)             # biased, centered
    inv_std = jax.lax.rsqrt(var + eps)                          # EUP
    y = xc * inv_std * (1.0 + scale) + shift
    o_ref[...] = y.astype(o_ref.dtype)


def ada_layer_norm_forward(x, timestep, params, *, eps=1e-5):
    """x: (B, S, D) float32; timestep: python int / 0-d int. Returns (B, S, D)."""
    B, S, D = x.shape
    emb_table = params["emb_table"].astype(jnp.float32)         # (num_emb, D)
    num_emb = emb_table.shape[0]
    # PyTorch Linear: y = e @ W.T + b  -> pass W.T so kernel does e @ W
    w_t = params["lin_w"].T.astype(jnp.float32)                 # (D, 2D)
    b = params["lin_b"].reshape(1, 2 * D).astype(jnp.float32)   # (1, 2D)

    # Flatten batch into the M dimension; pad to a sublane/tile-friendly size.
    M = B * S
    tm = min(512, _round_up(M, 8))
    M_pad = _round_up(M, tm)
    x2 = x.reshape(M, D)
    if M_pad != M:
        x2 = jnp.pad(x2, ((0, M_pad - M), (0, 0)))

    ts = jnp.asarray(timestep, dtype=jnp.int32).reshape(1)      # scalar prefetch

    kernel = functools.partial(_ada_ln_kernel, dim=D, eps=float(eps))

    out = pl.pallas_call(
        kernel,
        out_shape=jax.ShapeDtypeStruct((M_pad, D), x.dtype),
        grid_spec=pltpu.PrefetchScalarGridSpec(
            num_scalar_prefetch=1,
            grid=(M_pad // tm,),
            in_specs=[
                pl.BlockSpec((num_emb, D), lambda i, ts: (0, 0)),   # emb table
                pl.BlockSpec((D, 2 * D), lambda i, ts: (0, 0)),     # fused W
                pl.BlockSpec((1, 2 * D), lambda i, ts: (0, 0)),     # fused b
                pl.BlockSpec((tm, D), lambda i, ts: (i, 0)),        # x tile
            ],
            out_specs=pl.BlockSpec((tm, D), lambda i, ts: (i, 0)),
        ),
        compiler_params=pltpu.CompilerParams(
            dimension_semantics=("parallel",)),
    )(ts, emb_table, w_t, b, x2)

    return out[:M].reshape(B, S, D)


def reference_forward(x, timestep, params, *, eps=1e-5):
    """Pure-JAX mirror of the PyTorch module."""
    D = x.shape[-1]
    e = params["emb_table"][timestep]                            # (D,)
    e = e * jax.nn.sigmoid(e)                                    # SiLU
    emb = e @ params["lin_w"].T + params["lin_b"]                # (2D,)
    scale, shift = emb[:D], emb[D:]                              # torch.chunk(emb, 2)
    mean = x.mean(axis=-1, keepdims=True)
    var = jnp.mean((x - mean) ** 2, axis=-1, keepdims=True)      # biased
    xn = (x - mean) / jnp.sqrt(var + eps)
    return xn * (1.0 + scale) + shift


if __name__ == "__main__":
    # Small shapes consistent with the module: embedding_dim=128 tokens of a
    # (batch=2, seq=64) sequence, 16 possible timestep embeddings.
    B, S, D = 2, 64, 128
    num_embeddings = 16
    timestep = 7
    eps = 1e-5

    key = jax.random.PRNGKey(0)
    k1, k2, k3, k4 = jax.random.split(key, 4)
    params = {
        "emb_table": 0.5 * jax.random.normal(k1, (num_embeddings, D), dtype=jnp.float32),
        "lin_w": jax.random.normal(k2, (2 * D, D), dtype=jnp.float32) / math.sqrt(D),
        "lin_b": 0.1 * jax.random.normal(k3, (2 * D,), dtype=jnp.float32),
    }
    x = jax.random.normal(k4, (B, S, D), dtype=jnp.float32)

    out = ada_layer_norm_forward(x, timestep, params, eps=eps)
    out = jax.block_until_ready(out)

    ref = reference_forward(x, timestep, params, eps=eps)
    ref = jax.block_until_ready(ref)

    assert out.shape == (B, S, D)
    assert jnp.allclose(out, ref, rtol=1e-4, atol=1e-4), \
        f"max abs diff {jnp.max(jnp.abs(out - ref))}"
    print("KERNEL_OK")
</pallas_src>

<mosaic_0001>
module attributes {stable_mosaic.version = 11 : i64} {
  func.func @_ada_ln_kernel(%arg0: i32, %arg1: memref<1xi32, #tpu.memory_space<smem>>, %arg2: memref<16x128xf32, #tpu.memory_space<vmem>>, %arg3: memref<128x256xf32, #tpu.memory_space<vmem>>, %arg4: memref<1x256xf32, #tpu.memory_space<vmem>>, %arg5: memref<128x128xf32, #tpu.memory_space<vmem>>, %arg6: memref<128x128xf32, #tpu.memory_space<vmem>>) attributes {dimension_semantics = [#tpu.dimension_semantics<parallel>], iteration_bounds = array<i64: 1>, scalar_prefetch = 1 : i64, scratch_operands = 0 : i64, tpu.core_type = #tpu.core_type<tc>, window_params = [{pipeline_mode = #tpu.pipeline_mode<synchronous>, transform_indices = @transform_0, window_bounds = array<i64: 16, 128>}, {pipeline_mode = #tpu.pipeline_mode<synchronous>, transform_indices = @transform_1, window_bounds = array<i64: 128, 256>}, {pipeline_mode = #tpu.pipeline_mode<synchronous>, transform_indices = @transform_2, window_bounds = array<i64: 1, 256>}, {transform_indices = @transform_3, window_bounds = array<i64: 128, 128>}, {transform_indices = @transform_4, window_bounds = array<i64: 128, 128>}]} {
    %c0 = arith.constant 0 : index
    %0 = memref.load %arg1[%c0] : memref<1xi32, #tpu.memory_space<smem>>
    %1 = arith.index_cast %0 : i32 to index
    %c0_0 = arith.constant 0 : index
    %2 = vector.load %arg2[%1, %c0_0] : memref<16x128xf32, #tpu.memory_space<vmem>>, vector<1x128xf32>
    %3 = arith.negf %2 : vector<1x128xf32>
    %4 = math.exp %3 : vector<1x128xf32>
    %cst = arith.constant 1.000000e+00 : f32
    %5 = vector.broadcast %cst : f32 to vector<1x128xf32>
    %6 = arith.addf %5, %4 : vector<1x128xf32>
    %7 = arith.divf %5, %6 : vector<1x128xf32>
    %8 = arith.mulf %2, %7 : vector<1x128xf32>
    %c0_1 = arith.constant 0 : index
    %c0_2 = arith.constant 0 : index
    %9 = vector.load %arg3[%c0_1, %c0_2] : memref<128x256xf32, #tpu.memory_space<vmem>>, vector<128x256xf32>
    %cst_3 = arith.constant dense<0.000000e+00> : vector<1x256xf32>
    %10 = tpu.matmul %8, %9, %cst_3 {dimension_numbers = #tpu.dot_dimension_numbers<[1], [0], [0], [1], [0, 0, 1, 1], [], []>} : vector<1x128xf32>, vector<128x256xf32>, vector<1x256xf32> -> vector<1x256xf32>
    %c0_4 = arith.constant 0 : index
    %c0_5 = arith.constant 0 : index
    %11 = vector.load %arg4[%c0_4, %c0_5] : memref<1x256xf32, #tpu.memory_space<vmem>>, vector<1x256xf32>
    %12 = arith.addf %10, %11 : vector<1x256xf32>
    %13 = vector.extract_strided_slice %12 {offsets = [0, 0], sizes = [1, 128], strides = [1, 1]} : vector<1x256xf32> to vector<1x128xf32>
    %14 = vector.extract_strided_slice %12 {offsets = [0, 128], sizes = [1, 128], strides = [1, 1]} : vector<1x256xf32> to vector<1x128xf32>
    %c0_6 = arith.constant 0 : index
    %c0_7 = arith.constant 0 : index
    %15 = vector.load %arg5[%c0_6, %c0_7] : memref<128x128xf32, #tpu.memory_space<vmem>>, vector<128x128xf32>
    %cst_8 = arith.constant dense<0.000000e+00> : vector<128xf32>
    %16 = vector.multi_reduction <add>, %15, %cst_8 [1] : vector<128x128xf32> to vector<128xf32>
    %17 = vector.shape_cast %16 : vector<128xf32> to vector<128x1xf32>
    %cst_9 = arith.constant 1.280000e+02 : f32
    %18 = vector.broadcast %cst_9 : f32 to vector<128x1xf32>
    %19 = arith.divf %17, %18 : vector<128x1xf32>
    %20 = vector.broadcast %19 : vector<128x1xf32> to vector<128x128xf32>
    %21 = arith.subf %15, %20 : vector<128x128xf32>
    %22 = arith.mulf %21, %21 : vector<128x128xf32>
    %cst_10 = arith.constant dense<0.000000e+00> : vector<128xf32>
    %23 = vector.multi_reduction <add>, %22, %cst_10 [1] : vector<128x128xf32> to vector<128xf32>
    %24 = vector.shape_cast %23 : vector<128xf32> to vector<128x1xf32>
    %cst_11 = arith.constant 1.280000e+02 : f32
    %25 = vector.broadcast %cst_11 : f32 to vector<128x1xf32>
    %26 = arith.divf %24, %25 : vector<128x1xf32>
    %cst_12 = arith.constant 9.99999974E-6 : f32
    %27 = vector.broadcast %cst_12 : f32 to vector<128x1xf32>
    %28 = arith.addf %26, %27 : vector<128x1xf32>
    %29 = math.rsqrt %28 : vector<128x1xf32>
    %30 = vector.broadcast %29 : vector<128x1xf32> to vector<128x128xf32>
    %31 = arith.mulf %21, %30 : vector<128x128xf32>
    %cst_13 = arith.constant 1.000000e+00 : f32
    %32 = vector.broadcast %cst_13 : f32 to vector<1x128xf32>
    %33 = arith.addf %32, %13 : vector<1x128xf32>
    %34 = vector.broadcast %33 : vector<1x128xf32> to vector<128x128xf32>
    %35 = arith.mulf %31, %34 : vector<128x128xf32>
    %36 = vector.broadcast %14 : vector<1x128xf32> to vector<128x128xf32>
    %37 = arith.addf %35, %36 : vector<128x128xf32>
    %c0_14 = arith.constant 0 : index
    %c0_15 = arith.constant 0 : index
    %38 = vector.load %arg6[%c0_14, %c0_15] : memref<128x128xf32, #tpu.memory_space<vmem>>, vector<128x128xf32>
    tpu.vector_store %arg6[%c0_14, %c0_15], %37 {strides = array<i32>} : memref<128x128xf32, #tpu.memory_space<vmem>>, vector<128x128xf32>,
    return
  }
  func.func @transform_0(%arg0: i32, %arg1: memref<1xi32, #tpu.memory_space<smem>>) -> (i32, i32) {
    %c0_i32 = arith.constant 0 : i32
    %c0_i32_0 = arith.constant 0 : i32
    %c0_i32_1 = arith.constant 0 : i32
    return %c0_i32, %c0_i32_0 : i32, i32
  }
  func.func @transform_1(%arg0: i32, %arg1: memref<1xi32, #tpu.memory_space<smem>>) -> (i32, i32) {
    %c0_i32 = arith.constant 0 : i32
    %c0_i32_0 = arith.constant 0 : i32
    %c0_i32_1 = arith.constant 0 : i32
    return %c0_i32, %c0_i32_0 : i32, i32
  }
  func.func @transform_2(%arg0: i32, %arg1: memref<1xi32, #tpu.memory_space<smem>>) -> (i32, i32) {
    %c0_i32 = arith.constant 0 : i32
    %c0_i32_0 = arith.constant 0 : i32
    %c0_i32_1 = arith.constant 0 : i32
    return %c0_i32, %c0_i32_0 : i32, i32
  }
  func.func @transform_3(%arg0: i32, %arg1: memref<1xi32, #tpu.memory_space<smem>>) -> (i32, i32) {
    %c0_i32 = arith.constant 0 : i32
    %c0_i32_0 = arith.constant 0 : i32
    return %arg0, %c0_i32 : i32, i32
  }
  func.func @transform_4(%arg0: i32, %arg1: memref<1xi32, #tpu.memory_space<smem>>) -> (i32, i32) {
    %c0_i32 = arith.constant 0 : i32
    %c0_i32_0 = arith.constant 0 : i32
    return %arg0, %c0_i32 : i32, i32
  }
}

</mosaic_0001>

<bundles_post_ra>
// kernel: tpu_custom_call.1
= control target key start
LH: loop header
LB: loop body
LE: loop exit
PB: predicated region body
PF: predicated region fallthrough
CT: control target
= control target key end

     0   :  { %11 = vsyncpa [#allocation5], 0  ;;  %s909_s0 = inlined_call_operand.<no memory space> [shape: s32[1], index: 0, kind: input, shape index: {}]   ;;  %s910_s1 = inlined_call_operand.hbm [shape: f32[16,128], index: 1, kind: input, shape index: {}]   ;;  %s911_s2 = inlined_call_operand.hbm [shape: f32[128,256], index: 2, kind: input, shape index: {}]   ;;  %s912_s3 = inlined_call_operand.vmem [shape: f32[1,256], index: 3, kind: input, shape index: {}]   ;;  %s913_s4 = inlined_call_operand.hbm [shape: f32[128,128], index: 4, kind: input, shape index: {}]   ;;  %s914_s5 = inlined_call_operand.hbm [shape: f32[128,128], index: 5, kind: output, shape index: {}]  }
   0x1   :  { %12 = vsyncpa [#allocation8], 0 }
   0x2   :  { %13 = vsyncpa [#allocation6], 0  ;;  %s627_s18 = smov [#allocation7]   ;;  %s533_s22 = scalar_lea.hbm %s911_s2, 4096 }
   0x3   :  { %s31_s19 = sshll.u32 %s627_s18, 4  ;;  %p534_p0 = scmp.ne.s32.totalorder %s911_s2, %s533_s22  ;;  %s32_s19 = int_to_ptr.vmem [resolvable:$true] %s31_s19 }
   0x4   :  { %p537_p1 = scmp.lt.u32.totalorder %s533_s22, %s911_s2 }
   0x6   :  { %p539_p2 = pnand %p537_p1, %p534_p0 }
   0x8   :  { %542 = shalt.err (!%p539_p2)
}
   0x9   :  { %s543_s27 = scalar_lea.vmem %s32_s19, 4096  ;;  %p548_p4 = scmp.lt.s32.totalorder %s32_s19, %s32_s19 }
   0xa   :  { %p544_p3 = scmp.ne.s32.totalorder %s32_s19, %s543_s27  ;;  %p549_p5 = scmp.lt.s32.totalorder %s543_s27, %s543_s27 }
   0xc   :  { %p550_p6 = por %p549_p5, %p548_p4 }
   0xe   :  { %p551_p7 = pnand %p550_p6, %p544_p3 }
  0x10   :  { %554 = shalt.err (!%p551_p7)
}
  0x11   :  { %s628_s28 = smov 256   ;;  %s629_s29 = smov 16  }
  0x12   :  { %37 = dma.hbm_to_vmem [thread:$0]  %s911_s2, 4096, %s32_s19, [#allocation8], %s628_s28, %s628_s28, %s629_s29  }
  0x13   :  { %s630_s7 = smov [#allocation4]   ;;  %s555_s11 = scalar_lea.hbm %s910_s1, 256 }
  0x14   :  { %s19_s8 = sshll.u32 %s630_s7, 4  ;;  %p556_p8 = scmp.ne.s32.totalorder %s910_s1, %s555_s11  ;;  %s20_s8 = int_to_ptr.vmem [resolvable:$true] %s19_s8 }
  0x15   :  { %p559_p9 = scmp.lt.u32.totalorder %s555_s11, %s910_s1 }
  0x17   :  { %p561_p10 = pnand %p559_p9, %p556_p8 }
  0x19   :  { %564 = shalt.err (!%p561_p10)
}
  0x1a   :  { %s565_s16 = scalar_lea.vmem %s20_s8, 256  ;;  %p570_p12 = scmp.lt.s32.totalorder %s20_s8, %s20_s8 }
  0x1b   :  { %p566_p11 = scmp.ne.s32.totalorder %s20_s8, %s565_s16  ;;  %p571_p13 = scmp.lt.s32.totalorder %s565_s16, %s565_s16 }
  0x1d   :  { %p572_p0 = por %p571_p13, %p570_p12 }
  0x1f   :  { %p573_p1 = pnand %p572_p0, %p566_p11 }
  0x21   :  { %576 = shalt.err (!%p573_p1)
}
  0x22   :  { %s631_s2 = smov 128   ;;  %s632_s17 = smov 8  }
  0x23   :  { %25 = dma.hbm_to_vmem [thread:$0]  %s910_s1, 256, %s20_s8, [#allocation5], %s631_s2, %s631_s2, %s632_s17  }
  0x24   :  { %s633_s20 = smov [#allocation9]   ;;  %s577_s24 = scalar_lea.hbm %s913_s4, 2048 }
  0x25   :  { %s45_s21 = sshll.u32 %s633_s20, 4  ;;  %p578_p2 = scmp.ne.s32.totalorder %s913_s4, %s577_s24  ;;  %s46_s21 = int_to_ptr.vmem [resolvable:$true] %s45_s21 }
  0x26   :  { %p581_p3 = scmp.lt.u32.totalorder %s577_s24, %s913_s4 }
  0x28   :  { %p583_p4 = pnand %p581_p3, %p578_p2 }
  0x2a   :  { %586 = shalt.err (!%p583_p4)
}
  0x2b   :  { %s587_s29 = scalar_lea.vmem %s46_s21, 2048  ;;  %p592_p6 = scmp.lt.s32.totalorder %s46_s21, %s46_s21 }
  0x2c   :  { %p588_p5 = scmp.ne.s32.totalorder %s46_s21, %s587_s29  ;;  %p593_p7 = scmp.lt.s32.totalorder %s587_s29, %s587_s29 }
  0x2e   :  { %p594_p8 = por %p593_p7, %p592_p6 }
  0x30   :  { %p595_p9 = pnand %p594_p8, %p588_p5 }
  0x32   :  { %598 = shalt.err (!%p595_p9)
}
  0x33   :  { %51 = dma.hbm_to_vmem [thread:$0]  %s913_s4, 2048, %s46_s21, [#allocation8], %s631_s2, %s631_s2, %s632_s17  }
  0x34   :  { %621 = dma.done.wait [#allocation5], 256  }
  0x35   :  { %622 = vsyncadd [#allocation5], 4294967040 }
  0x36   :  { %623 = dma.done.wait [#allocation8], 6144  }
  0x37   :  { %624 = vsyncadd [#allocation8], 4294961152  ;;  %v634_v0 = vmov 0.0   ;;  %v708_v1 = vld [vmem:[#allocation9] sm:$0xff]  ;;  %v710_v2 = vld [vmem:[#allocation9 + $0x10] sm:$0xff]  ;;  %s62_s7 = scalar_lea.vmem [#allocation4], %s909_s0 }
  0x38   :  { %179 = vmatprep.mubr.f32.mxu0 %v634_v0  ;;  %202 = vadd.xlane.f32.xlu0 %v708_v1  ;;  %v714_v3 = vld [vmem:[#allocation9 + $0x8] sm:$0xff]  ;;  %v716_v4 = vld [vmem:[#allocation9 + $0x18] sm:$0xff]  ;;  %v718_v5 = vld [vmem:[#allocation9 + $0x20] sm:$0xff] }
  0x39   :  { %206 = vadd.xlane.f32.xlu1 %v710_v2  ;;  %v722_v6 = vld [vmem:[#allocation9 + $0x28] sm:$0xff]  ;;  %v74_v8 = vld [vmem:[#allocation7 + $0x18] sm:$0xff]  ;;  %v71_v10 = vld [vmem:[#allocation7] sm:$0xff] }
  0x3a   :  { %v72_v7 = vld [vmem:[#allocation7 + $0x8] sm:$0xff]  ;;  %v73_v11 = vld [vmem:[#allocation7 + $0x10] sm:$0xff]  ;;  %v78_v14 = vld [vmem:[#allocation7 + $0x38] sm:$0xff] }
  0x3b   :  { %v456_v9 = vpack.c.bf16 %v74_v8, %v72_v7  ;;  %v76_v12 = vld [vmem:[#allocation7 + $0x28] sm:$0xff]  ;;  %v458_v13 = vpack.c.bf16 %v73_v11, %v71_v10  ;;  %v75_v15 = vld [vmem:[#allocation7 + $0x20] sm:$0xff]  ;;  %v77_v16 = vld [vmem:[#allocation7 + $0x30] sm:$0xff] }
  0x3c   :  { %204 = vadd.xlane.f32.xlu0 %v714_v3  ;;  %v460_v17 = vpack.c.bf16 %v78_v14, %v76_v12  ;;  %v80_v18 = vld [vmem:[#allocation7 + $0x48] sm:$0xff]  ;;  %v82_v19 = vld [vmem:[#allocation7 + $0x58] sm:$0xff]  ;;  %v726_v20 = vld [vmem:[#allocation9 + $0x30] sm:$0xff]  ;;  %v462_v22 = vpack.c.bf16 %v77_v16, %v75_v15 }
  0x3d   :  { %208 = vadd.xlane.f32.xlu1 %v716_v4  ;;  %457 = vmatprep.subr.bf16.mxu0 %v456_v9  ;;  %v728_v21 = vld [vmem:[#allocation9 + $0x38] sm:$0xff]  ;;  %v464_v23 = vpack.c.bf16 %v82_v19, %v80_v18  ;;  %v79_v24 = vld [vmem:[#allocation7 + $0x40] sm:$0xff]  ;;  %v81_v25 = vld [vmem:[#allocation7 + $0x50] sm:$0xff] }
  0x3e   :  { %459 = vmatpush1.bf16.msra.mxu0 %v458_v13  ;;  %v84_v26 = vld [vmem:[#allocation7 + $0x68] sm:$0xff]  ;;  %v86_v27 = vld [vmem:[#allocation7 + $0x78] sm:$0xff]  ;;  %v732_v28 = vld [vmem:[#allocation9 + $0x40] sm:$0xff]  ;;  %v466_v30 = vpack.c.bf16 %v81_v25, %v79_v24 }
  0x3f   :  { %461 = vmatprep.subr.bf16.mxu0 %v460_v17  ;;  %v734_v29 = vld [vmem:[#allocation9 + $0x48] sm:$0xff]  ;;  %v468_v31 = vpack.c.bf16 %v86_v27, %v84_v26  ;;  %v83_v32 = vld [vmem:[#allocation7 + $0x60] sm:$0xff]  ;;  %v85_v33 = vld [vmem:[#allocation7 + $0x70] sm:$0xff] }
  0x40   :  { %210 = vadd.xlane.f32.xlu0 %v718_v5  ;;  %v88_v34 = vld [vmem:[#allocation7 + $0x88] sm:$0xff]  ;;  %v90_v35 = vld [vmem:[#allocation7 + $0x98] sm:$0xff]  ;;  %v63_v36 = vld [vmem:[%s62_s7] sm:$0x1]  ;;  %v470_v40 = vpack.c.bf16 %v85_v33, %v83_v32 }
  0x41   :  { %212 = vadd.xlane.f32.xlu1 %v722_v6  ;;  %v455_v37 = vmul.f32 -1.442695, %v63_v36  ;;  %v741_v38 = vld [vmem:[#allocation9 + $0x50] sm:$0xff]  ;;  %v743_v39 = vld [vmem:[#allocation9 + $0x58] sm:$0xff]  ;;  %v472_v41 = vpack.c.bf16 %v90_v35, %v88_v34  ;;  %v87_v42 = vld [vmem:[#allocation7 + $0x80] sm:$0xff] }
  0x42   :  { %463 = vmatpush1.bf16.msra.mxu0 %v462_v22  ;;  %v89_v43 = vld [vmem:[#allocation7 + $0x90] sm:$0xff]  ;;  %v92_v44 = vld [vmem:[#allocation7 + $0xa8] sm:$0xff]  ;;  %v94_v45 = vld [vmem:[#allocation7 + $0xb8] sm:$0xff] }
  0x43   :  { %465 = vmatprep.subr.bf16.mxu0 %v464_v23  ;;  %497 = vpow2.f32 %v455_v37  ;;  %v747_v46 = vld [vmem:[#allocation9 + $0x60] sm:$0xff]  ;;  %v749_v47 = vld [vmem:[#allocation9 + $0x68] sm:$0xff]  ;;  %v474_v48 = vpack.c.bf16 %v89_v43, %v87_v42  ;;  %v476_v49 = vpack.c.bf16 %v94_v45, %v92_v44  ;;  %v93_v51 = vld [vmem:[#allocation7 + $0xb0] sm:$0xff] }
  0x44   :  { %214 = vadd.xlane.f32.xlu0 %v726_v20  ;;  %v91_v50 = vld [vmem:[#allocation7 + $0xa0] sm:$0xff]  ;;  %v96_v52 = vld [vmem:[#allocation7 + $0xc8] sm:$0xff]  ;;  %v98_v53 = vld [vmem:[#allocation7 + $0xd8] sm:$0xff] }
  0x45   :  { %216 = vadd.xlane.f32.xlu1 %v728_v21  ;;  %v753_v54 = vld [vmem:[#allocation9 + $0x70] sm:$0xff]  ;;  %v755_v55 = vld [vmem:[#allocation9 + $0x78] sm:$0xff]  ;;  %v478_v56 = vpack.c.bf16 %v93_v51, %v91_v50  ;;  %v480_v57 = vpack.c.bf16 %v98_v53, %v96_v52  ;;  %v95_v58 = vld [vmem:[#allocation7 + $0xc0] sm:$0xff] }
  0x46   :  { %467 = vmatpush1.bf16.msra.mxu0 %v466_v30  ;;  %v97_v59 = vld [vmem:[#allocation7 + $0xd0] sm:$0xff]  ;;  %v100_v60 = vld [vmem:[#allocation7 + $0xe8] sm:$0xff]  ;;  %v102_v61 = vld [vmem:[#allocation7 + $0xf8] sm:$0xff] }
  0x47   :  { %469 = vmatprep.subr.bf16.mxu0 %v468_v31  ;;  %v482_v63 = vpack.c.bf16 %v97_v59, %v95_v58  ;;  %v484_v7 = vpack.c.bf16 %v102_v61, %v100_v60  ;;  %v99_v8 = vld [vmem:[#allocation7 + $0xe0] sm:$0xff]  ;;  %v101_v9 = vld [vmem:[#allocation7 + $0xf0] sm:$0xff] }
  0x48   :  { %218 = vadd.xlane.f32.xlu0 %v732_v28  ;;  %v486_v10 = vpack.c.bf16 %v101_v9, %v99_v8 }
  0x49   :  { %220 = vadd.xlane.f32.xlu1 %v734_v29 }
  0x4a   :  { %471 = vmatpush1.bf16.msra.mxu0 %v470_v40 }
  0x4b   :  { %473 = vmatprep.subr.bf16.mxu0 %v472_v41 }
  0x4c   :  { %222 = vadd.xlane.f32.xlu0 %v741_v38 }
  0x4d   :  { %224 = vadd.xlane.f32.xlu1 %v743_v39  ;;  %v498_v62 = vpop.eup %497 }
  0x4e   :  { %475 = vmatpush1.bf16.msra.mxu0 %v474_v48  ;;  %v67_v0 = vadd.f32 1.0, %v498_v62 }
  0x4f   :  { %477 = vmatprep.subr.bf16.mxu0 %v476_v49 }
  0x50   :  { %226 = vadd.xlane.f32.xlu0 %v747_v46  ;;  %499 = vrcp.f32 %v67_v0 }
  0x51   :  { %228 = vadd.xlane.f32.xlu1 %v749_v47 }
  0x52   :  { %479 = vmatpush1.bf16.msra.mxu0 %v478_v56 }
  0x53   :  { %481 = vmatprep.subr.bf16.mxu0 %v480_v57 }
  0x54   :  { %230 = vadd.xlane.f32.xlu0 %v753_v54 }
  0x55   :  { %232 = vadd.xlane.f32.xlu1 %v755_v55 }
  0x56   :  { %483 = vmatpush1.bf16.msra.mxu0 %v482_v63 }
  0x57   :  { %485 = vmatprep.subr.bf16.mxu0 %v484_v7 }
  0x5a   :  { %487 = vmatpush1.bf16.msra.mxu0 %v486_v10  ;;  %v500_v11 = vpop.eup %499 }
  0x5b   :  { %v70_v12 = vmul.f32 %v500_v11, %v63_v36 }
  0x5d   :  { %180 = vmatmul.mubr.f32.vlgmr.msra.gmra.mrb[0].mxu0 %v70_v12 }
  0xc5   :  { %v203_v13 = vpop.xlane.xlu0 %202 }
  0xc6   :  { %v207_v14 = vpop.xlane.xlu1 %206  ;;  %v235_v15 = vmul.f32 0.0078125, %v203_v13 }
  0xc7   :  { %v237_v16 = vmul.f32 0.0078125, %v207_v14 }
  0xc8   :  { %v760_v17 = vsub.f32 %v708_v1, %v235_v15 }
  0xc9   :  { %v763_v18 = vsub.f32 %v710_v2, %v237_v16  ;;  %v205_v19 = vpop.xlane.xlu0 %204  ;;  %v105_v16 = vlaneseq }
  0xca   :  { %v209_v22 = vpop.xlane.xlu1 %208  ;;  %v236_v23 = vmul.f32 0.0078125, %v205_v19  ;;  %v267_v24 = vmul.f32 %v760_v17, %v760_v17 }
  0xcb   :  { %v238_v25 = vmul.f32 0.0078125, %v209_v22  ;;  %v269_v1 = vmul.f32 %v763_v18, %v763_v18  ;;  %v106_v19 = vshrl.u32 %v105_v16, 7 }
  0xcc   :  { %v768_v26 = vsub.f32 %v714_v3, %v236_v23  ;;  %283 = vadd.xlane.f32.xlu0 %v267_v24 }
  0xcd   :  { %v771_v27 = vsub.f32 %v716_v4, %v238_v25  ;;  %v211_v30 = vpop.xlane.xlu0 %210  ;;  %v107_v22 = vsub.s32 0, %v106_v19 }
  0xce   :  { %v213_v2 = vpop.xlane.xlu1 %212  ;;  %v239_v31 = vmul.f32 0.0078125, %v211_v30  ;;  %v268_v32 = vmul.f32 %v768_v26, %v768_v26 }
  0xcf   :  { %v240_v33 = vmul.f32 0.0078125, %v213_v2  ;;  %v270_v4 = vmul.f32 %v771_v27, %v771_v27 }
  0xd0   :  { %v778_v34 = vsub.f32 %v718_v5, %v239_v31  ;;  %287 = vadd.xlane.f32.xlu0 %v269_v1  ;;  %285 = vadd.xlane.f32.xlu1 %v268_v32  ;;  %v111_v31 = vsub.s32 1, %v106_v19 }
  0xd1   :  { %v781_v3 = vsub.f32 %v722_v6, %v240_v33  ;;  %v215_v35 = vpop.xlane.xlu0 %214 }
  0xd2   :  { %v217_v36 = vpop.xlane.xlu1 %216  ;;  %v241_v37 = vmul.f32 0.0078125, %v215_v35  ;;  %v271_v40 = vmul.f32 %v778_v34, %v778_v34 }
  0xd3   :  { %v242_v41 = vmul.f32 0.0078125, %v217_v36  ;;  %v272_v6 = vmul.f32 %v781_v3, %v781_v3 }
  0xd4   :  { %v788_v42 = vsub.f32 %v726_v20, %v241_v37  ;;  %289 = vadd.xlane.f32.xlu1 %v270_v4  ;;  %291 = vadd.xlane.f32.xlu0 %v271_v40 }
  0xd5   :  { %v791_v5 = vsub.f32 %v728_v21, %v242_v41  ;;  %v219_v43 = vpop.xlane.xlu0 %218 }
  0xd6   :  { %v221_v44 = vpop.xlane.xlu1 %220  ;;  %v243_v45 = vmul.f32 0.0078125, %v219_v43  ;;  %v273_v48 = vmul.f32 %v788_v42, %v788_v42 }
  0xd7   :  { %v244_v49 = vmul.f32 0.0078125, %v221_v44  ;;  %v274_v21 = vmul.f32 %v791_v5, %v791_v5 }
  0xd8   :  { %v798_v50 = vsub.f32 %v732_v28, %v243_v45  ;;  %293 = vadd.xlane.f32.xlu1 %v272_v6  ;;  %295 = vadd.xlane.f32.xlu0 %v273_v48 }
  0xd9   :  { %v801_v20 = vsub.f32 %v734_v29, %v244_v49  ;;  %v223_v51 = vpop.xlane.xlu0 %222 }
  0xda   :  { %v225_v52 = vpop.xlane.xlu1 %224  ;;  %v245_v53 = vmul.f32 0.0078125, %v223_v51  ;;  %v275_v56 = vmul.f32 %v798_v50, %v798_v50 }
  0xdb   :  { %v246_v57 = vmul.f32 0.0078125, %v225_v52  ;;  %v276_v29 = vmul.f32 %v801_v20, %v801_v20 }
  0xdc   :  { %v808_v58 = vsub.f32 %v741_v38, %v245_v53  ;;  %297 = vadd.xlane.f32.xlu1 %v274_v21  ;;  %299 = vadd.xlane.f32.xlu0 %v275_v56 }
  0xdd   :  { %v811_v28 = vsub.f32 %v743_v39, %v246_v57  ;;  %v227_v59 = vpop.xlane.xlu0 %226 }
  0xde   :  { %v229_v60 = vpop.xlane.xlu1 %228  ;;  %v247_v61 = vmul.f32 0.0078125, %v227_v59  ;;  %v277_v62 = vmul.f32 %v808_v58, %v808_v58 }
  0xdf   :  { %v248_v63 = vmul.f32 0.0078125, %v229_v60  ;;  %v278_v39 = vmul.f32 %v811_v28, %v811_v28 }
  0xe0   :  { %v818_v0 = vsub.f32 %v747_v46, %v247_v61  ;;  %301 = vadd.xlane.f32.xlu1 %v276_v29  ;;  %303 = vadd.xlane.f32.xlu0 %v277_v62 }
  0xe1   :  { %v821_v38 = vsub.f32 %v749_v47, %v248_v63  ;;  %v231_v7 = vpop.xlane.xlu0 %230 }
  0xe2   :  { %v233_v8 = vpop.xlane.xlu1 %232  ;;  %v249_v9 = vmul.f32 0.0078125, %v231_v7  ;;  %v279_v10 = vmul.f32 %v818_v0, %v818_v0 }
  0xe3   :  { %v250_v11 = vmul.f32 0.0078125, %v233_v8  ;;  %v280_v47 = vmul.f32 %v821_v38, %v821_v38 }
  0xe4   :  { %v828_v12 = vsub.f32 %v753_v54, %v249_v9  ;;  %305 = vadd.xlane.f32.xlu1 %v278_v39  ;;  %307 = vadd.xlane.f32.xlu0 %v279_v10 }
  0xe5   :  { %v831_v46 = vsub.f32 %v755_v55, %v250_v11  ;;  %v103_v55 = vld [vmem:[%s912_s3] sm:$0x3]  ;;  %s635_s3 = smov [#allocation10]  }
  0xe6   :  { %v281_v13 = vmul.f32 %v828_v12, %v828_v12  ;;  %v108_v25 = vrot.slane %v103_v55, %v107_v22  ;;  %v112_v41 = vrot.slane %v103_v55, %v111_v31  ;;  %s441_s9 = sshll.u32 %s635_s3, 4  ;;  %s442_s9 = int_to_ptr.vmem [resolvable:$true] %s441_s9 }
  0xe7   :  { %v282_v14 = vmul.f32 %v831_v46, %v831_v46  ;;  %s599_s10 = scalar_lea.vmem %s442_s9, 2048  ;;  %p604_p11 = scmp.lt.s32.totalorder %s442_s9, %s442_s9 }
  0xe8   :  { %309 = vadd.xlane.f32.xlu1 %v280_v47  ;;  %311 = vadd.xlane.f32.xlu0 %v281_v13  ;;  %p600_p10 = scmp.ne.s32.totalorder %s442_s9, %s599_s10  ;;  %p605_p12 = scmp.lt.s32.totalorder %s599_s10, %s599_s10 }
  0xea   :  { %p606_p13 = por %p605_p12, %p604_p11 }
  0xec   :  { %313 = vadd.xlane.f32.xlu1 %v282_v14  ;;  %p607_p0 = pnand %p606_p13, %p600_p10 }
 0x130   :  { %v181_v15 = vpop.f32.mrb[0].mxu0 }
 0x131   :  { %v183_v54 = vpop.f32.mrb[1].mxu0  ;;  %v182_v4 = vadd.f32 %v181_v15, %v108_v25 }
 0x132   :  { %v184_v51 = vadd.f32 %v183_v54, %v112_v41 }
 0x133   :  { %v379_v44 = vadd.f32 1.0, %v182_v4 }
 0x134   :  { %v845_v61 = vrot.slane %v184_v51, %v107_v22 }
 0x135   :  { %v842_v56 = vrot.slane %v379_v44, %v107_v22 }
 0x159   :  { %v284_v23 = vpop.xlane.xlu0 %283 }
 0x15a   :  { %v315_v24 = vmul.f32 0.0078125, %v284_v23 }
 0x15c   :  { %v331_v1 = vadd.f32 1e-05, %v315_v24 }
 0x15d   :  { %v286_v30 = vpop.xlane.xlu1 %285  ;;  %v288_v2 = vpop.xlane.xlu0 %287 }
 0x15e   :  { %501 = vrsqrt.f32 %v331_v1  ;;  %v316_v32 = vmul.f32 0.0078125, %v286_v30  ;;  %v317_v33 = vmul.f32 0.0078125, %v288_v2 }
 0x160   :  { %v332_v35 = vadd.f32 1e-05, %v316_v32  ;;  %v333_v36 = vadd.f32 1e-05, %v317_v33 }
 0x161   :  { %v290_v37 = vpop.xlane.xlu1 %289  ;;  %v292_v40 = vpop.xlane.xlu0 %291 }
 0x162   :  { %503 = vrsqrt.f32 %v332_v35  ;;  %v318_v6 = vmul.f32 0.0078125, %v290_v37  ;;  %v319_v43 = vmul.f32 0.0078125, %v292_v40 }
 0x163   :  { %505 = vrsqrt.f32 %v333_v36 }
 0x164   :  { %v334_v45 = vadd.f32 1e-05, %v318_v6  ;;  %v335_v48 = vadd.f32 1e-05, %v319_v43 }
 0x165   :  { %v294_v49 = vpop.xlane.xlu1 %293  ;;  %v296_v21 = vpop.xlane.xlu0 %295 }
 0x166   :  { %507 = vrsqrt.f32 %v334_v45  ;;  %v320_v52 = vmul.f32 0.0078125, %v294_v49  ;;  %v321_v53 = vmul.f32 0.0078125, %v296_v21 }
 0x167   :  { %509 = vrsqrt.f32 %v335_v48 }
 0x168   :  { %v502_v57 = vpop.eup %501  ;;  %v336_v29 = vadd.f32 1e-05, %v320_v52  ;;  %v337_v59 = vadd.f32 1e-05, %v321_v53 }
 0x169   :  { %v363_v60 = vmul.f32 %v502_v57, %v760_v17  ;;  %v298_v62 = vpop.xlane.xlu1 %297  ;;  %v300_v63 = vpop.xlane.xlu0 %299 }
 0x16a   :  { %511 = vrsqrt.f32 %v336_v29  ;;  %v322_v39 = vmul.f32 0.0078125, %v298_v62  ;;  %v323_v7 = vmul.f32 0.0078125, %v300_v63 }
 0x16b   :  { %513 = vrsqrt.f32 %v337_v59  ;;  %v384_v8 = vmul.f32 %v842_v56, %v363_v60 }
 0x16c   :  { %v504_v9 = vpop.eup %503  ;;  %v338_v10 = vadd.f32 1e-05, %v322_v39  ;;  %v339_v11 = vadd.f32 1e-05, %v323_v7 }
 0x16d   :  { %v506_v47 = vpop.eup %505  ;;  %v364_v13 = vmul.f32 %v504_v9, %v768_v26  ;;  %v302_v14 = vpop.xlane.xlu1 %301  ;;  %v404_v17 = vadd.f32 %v845_v61, %v384_v8 }
 0x16e   :  { %v304_v15 = vpop.xlane.xlu0 %303  ;;  %v365_v54 = vmul.f32 %v506_v47, %v763_v18  ;;  %515 = vrsqrt.f32 %v338_v10  ;;  %v324_v16 = vmul.f32 0.0078125, %v302_v14 }
 0x16f   :  { %v325_v19 = vmul.f32 0.0078125, %v304_v15  ;;  %517 = vrsqrt.f32 %v339_v11  ;;  %v385_v22 = vmul.f32 %v842_v56, %v364_v13  ;;  %420 = vst [vmem:[#allocation10] sm:$0xff] %v404_v17 }
 0x170   :  { %v508_v55 = vpop.eup %507  ;;  %v340_v23 = vadd.f32 1e-05, %v324_v16  ;;  %v386_v25 = vmul.f32 %v842_v56, %v365_v54 }
 0x171   :  { %v341_v24 = vadd.f32 1e-05, %v325_v19  ;;  %v510_v1 = vpop.eup %509  ;;  %v366_v26 = vmul.f32 %v508_v55, %v771_v27  ;;  %v306_v30 = vpop.xlane.xlu1 %305  ;;  %v405_v31 = vadd.f32 %v845_v61, %v385_v22 }
 0x172   :  { %v308_v2 = vpop.xlane.xlu0 %307  ;;  %v367_v18 = vmul.f32 %v510_v1, %v778_v34  ;;  %519 = vrsqrt.f32 %v340_v23  ;;  %v326_v32 = vmul.f32 0.0078125, %v306_v30  ;;  %v406_v35 = vadd.f32 %v845_v61, %v386_v25 }
 0x173   :  { %v327_v33 = vmul.f32 0.0078125, %v308_v2  ;;  %521 = vrsqrt.f32 %v341_v24  ;;  %v387_v4 = vmul.f32 %v842_v56, %v366_v26  ;;  %421 = vst [vmem:[#allocation10 + $0x8] sm:$0xff] %v405_v31 }
 0x174   :  { %v512_v36 = vpop.eup %511  ;;  %v342_v37 = vadd.f32 1e-05, %v326_v32  ;;  %v388_v27 = vmul.f32 %v842_v56, %v367_v18  ;;  %422 = vst [vmem:[#allocation10 + $0x10] sm:$0xff] %v406_v35 }
 0x175   :  { %v343_v40 = vadd.f32 1e-05, %v327_v33  ;;  %v514_v41 = vpop.eup %513  ;;  %v368_v6 = vmul.f32 %v512_v36, %v781_v3  ;;  %v310_v43 = vpop.xlane.xlu1 %309  ;;  %v407_v34 = vadd.f32 %v845_v61, %v387_v4 }
 0x176   :  { %v312_v44 = vpop.xlane.xlu0 %311  ;;  %v369_v45 = vmul.f32 %v514_v41, %v788_v42  ;;  %523 = vrsqrt.f32 %v342_v37  ;;  %v328_v48 = vmul.f32 0.0078125, %v310_v43  ;;  %v408_v51 = vadd.f32 %v845_v61, %v388_v27 }
 0x177   :  { %v329_v49 = vmul.f32 0.0078125, %v312_v44  ;;  %v389_v21 = vmul.f32 %v842_v56, %v368_v6  ;;  %525 = vrsqrt.f32 %v343_v40  ;;  %423 = vst [vmem:[#allocation10 + $0x18] sm:$0xff] %v407_v34 }
 0x178   :  { %v516_v52 = vpop.eup %515  ;;  %v390_v53 = vmul.f32 %v842_v56, %v369_v45  ;;  %v344_v3 = vadd.f32 1e-05, %v328_v48  ;;  %424 = vst [vmem:[#allocation10 + $0x20] sm:$0xff] %v408_v51 }
 0x179   :  { %v345_v57 = vadd.f32 1e-05, %v329_v49  ;;  %v518_v29 = vpop.eup %517  ;;  %v370_v59 = vmul.f32 %v516_v52, %v791_v5  ;;  %v314_v60 = vpop.xlane.xlu1 %313  ;;  %v409_v42 = vadd.f32 %v845_v61, %v389_v21 }
 0x17a   :  { %v371_v62 = vmul.f32 %v518_v29, %v798_v50  ;;  %527 = vrsqrt.f32 %v344_v3  ;;  %v330_v63 = vmul.f32 0.0078125, %v314_v60  ;;  %v410_v39 = vadd.f32 %v845_v61, %v390_v53 }
 0x17b   :  { %v391_v7 = vmul.f32 %v842_v56, %v370_v59  ;;  %529 = vrsqrt.f32 %v345_v57  ;;  %425 = vst [vmem:[#allocation10 + $0x28] sm:$0xff] %v409_v42 }
 0x17c   :  { %v520_v8 = vpop.eup %519  ;;  %v392_v9 = vmul.f32 %v842_v56, %v371_v62  ;;  %v346_v10 = vadd.f32 1e-05, %v330_v63  ;;  %426 = vst [vmem:[#allocation10 + $0x30] sm:$0xff] %v410_v39 }
 0x17d   :  { %v522_v5 = vpop.eup %521  ;;  %v411_v11 = vadd.f32 %v845_v61, %v391_v7  ;;  %v372_v47 = vmul.f32 %v520_v8, %v801_v20 }
 0x17e   :  { %v412_v50 = vadd.f32 %v845_v61, %v392_v9  ;;  %v373_v13 = vmul.f32 %v522_v5, %v808_v58  ;;  %531 = vrsqrt.f32 %v346_v10 }
 0x17f   :  { %427 = vst [vmem:[#allocation10 + $0x38] sm:$0xff] %v411_v11  ;;  %v393_v14 = vmul.f32 %v842_v56, %v372_v47 }
 0x180   :  { %v524_v15 = vpop.eup %523  ;;  %428 = vst [vmem:[#allocation10 + $0x40] sm:$0xff] %v412_v50  ;;  %v394_v17 = vmul.f32 %v842_v56, %v373_v13 }
 0x181   :  { %v526_v54 = vpop.eup %525  ;;  %v413_v16 = vadd.f32 %v845_v61, %v393_v14  ;;  %v374_v19 = vmul.f32 %v524_v15, %v811_v28 }
 0x182   :  { %v414_v22 = vadd.f32 %v845_v61, %v394_v17  ;;  %v375_v20 = vmul.f32 %v526_v54, %v818_v0 }
 0x183   :  { %429 = vst [vmem:[#allocation10 + $0x48] sm:$0xff] %v413_v16  ;;  %v395_v58 = vmul.f32 %v842_v56, %v374_v19 }
 0x184   :  { %v528_v55 = vpop.eup %527  ;;  %430 = vst [vmem:[#allocation10 + $0x50] sm:$0xff] %v414_v22  ;;  %v396_v23 = vmul.f32 %v842_v56, %v375_v20 }
 0x185   :  { %v530_v24 = vpop.eup %529  ;;  %v415_v25 = vadd.f32 %v845_v61, %v395_v58  ;;  %v376_v1 = vmul.f32 %v528_v55, %v821_v38 }
 0x186   :  { %v416_v26 = vadd.f32 %v845_v61, %v396_v23  ;;  %v377_v28 = vmul.f32 %v530_v24, %v828_v12 }
 0x187   :  { %431 = vst [vmem:[#allocation10 + $0x58] sm:$0xff] %v415_v25  ;;  %v397_v30 = vmul.f32 %v842_v56, %v376_v1 }
 0x188   :  { %v532_v0 = vpop.eup %531  ;;  %432 = vst [vmem:[#allocation10 + $0x60] sm:$0xff] %v416_v26  ;;  %v398_v2 = vmul.f32 %v842_v56, %v377_v28 }
 0x189   :  { %v417_v31 = vadd.f32 %v845_v61, %v397_v30  ;;  %v378_v18 = vmul.f32 %v532_v0, %v831_v46 }
 0x18a   :  { %v418_v32 = vadd.f32 %v845_v61, %v398_v2 }
 0x18b   :  { %433 = vst [vmem:[#allocation10 + $0x68] sm:$0xff] %v417_v31  ;;  %v399_v38 = vmul.f32 %v842_v56, %v378_v18 }
 0x18c   :  { %434 = vst [vmem:[#allocation10 + $0x70] sm:$0xff] %v418_v32 }
 0x18d   :  { %v419_v12 = vadd.f32 %v845_v61, %v399_v38 }
 0x18f   :  { %435 = vst [vmem:[#allocation10 + $0x78] sm:$0xff] %v419_v12 }
 0x190   :  { %610 = shalt.err (!%p607_p0)
}
 0x191   :  { %s611_s13 = scalar_lea.hbm %s914_s5, 2048 }
 0x192   :  { %p612_p1 = scmp.ne.s32.totalorder %s914_s5, %s611_s13  ;;  %p615_p2 = scmp.lt.u32.totalorder %s611_s13, %s914_s5 }
 0x194   :  { %p617_p3 = pnand %p615_p2, %p612_p1 }
 0x196   :  { %620 = shalt.err (!%p617_p3)
}
 0x197   :  { %447 = dma.vmem_to_hbm [thread:$0]  %s442_s9, 2048, %s914_s5, [#allocation6], %s631_s2, %s631_s2, %s632_s17  }
 0x198   :  { %625 = dma.done.wait [#allocation6], 2048  }
 0x199   :  { %626 = vsyncadd [#allocation6], 4294965248 }
 0x19a   :  { %451 = vsyncpa [#allocation5], 1 }
 0x19b   :  { %452 = vsyncpa [#allocation8], 1 }
 0x19c   :  { %453 = vsyncpa [#allocation6], 1 }

</bundles_post_ra>
